<compile_context>
chip_gen: v6e
topology: v6e:2x2x1
jax: 0.10.0
libtpu: 0.0.40
codegen_flags: <defaults>
</compile_context>

<pallas_src>
import functools

import jax
import jax.numpy as jnp
from jax import lax
from jax.experimental import pallas as pl
from jax.experimental.pallas import tpu as pltpu


BLOCK_ELEMS = 512 * 1024                 # 2 MiB of f32 per streamed tile
FAST_PATH_MAX_BYTES = 4 * 1024 * 1024    # single-pass path if padded f32 slab <= 4 MiB


def _round_up(v, m):
    return (v + m - 1) // m * m


def _pick_lane_width(n):
    """Largest lane width in {512, 256, 128} dividing n; else pad up to 128."""
    for lw in (512, 256, 128):
        if n % lw == 0:
            return lw, 0
    return 128, (-n) % 128


# --------------------------------------------------------------------------
# Kernels
# --------------------------------------------------------------------------
def _fused_kernel(x_ref, o_ref, *, numel):
    """Single-pass path: whole slab resident in VMEM; read once, write once."""
    x = x_ref[...].astype(jnp.float32)
    total = jnp.sum(x, keepdims=True)                  # (1, 1)
    inv_mean = jnp.float32(numel) / total              # numel / sum == 1 / mean
    o_ref[...] = (x * inv_mean).astype(o_ref.dtype)


def _sum_kernel(x_ref, psum_ref, acc_ref, *, rows, block_r, tiles_per_shard,
                needs_mask):
    """Streamed global sum.  grid = (num_shards ['parallel'], tiles ['arbitrary'])."""
    c = pl.program_id(0)   # shard (maps to a TensorCore under megacore)
    j = pl.program_id(1)   # tile within shard (reduction axis)

    @pl.when(j == 0)
    def _init():
        acc_ref[...] = jnp.zeros_like(acc_ref)

    x = x_ref[...].astype(jnp.float32)
    if needs_mask:
        # Ragged last tile and/or duplicated (index-clamped) tiles: zero out
        # rows that do not belong to this logical tile.  rem <= 0 masks all.
        tile = c * tiles_per_shard + j
        rem = rows - tile * block_r
        row_ids = lax.broadcasted_iota(jnp.int32, x.shape, 0)
        x = jnp.where(row_ids < rem, x, 0.0)

    # Lane-dense (1, lw) accumulator: sublane-direction partial sum per tile
    # (vector adds + one small intra-vreg collapse), no (block_r, 1)
    # lane-padded accumulator traffic.
    acc_ref[...] += jnp.sum(x, axis=0, keepdims=True)

    @pl.when(j == tiles_per_shard - 1)
    def _finalize():
        psum_ref[...] = jnp.zeros_like(psum_ref)
        psum_ref[0:1, :] = acc_ref[...]


def _scale_kernel(inv_ref, x_ref, o_ref):
    """out = x * inv_mean; inv_mean is a scalar living in SMEM."""
    inv = inv_ref[0]
    o_ref[...] = (x_ref[...].astype(jnp.float32) * inv).astype(o_ref.dtype)


# --------------------------------------------------------------------------
# Wrapper
# --------------------------------------------------------------------------
@jax.jit
def contrast_normalize(x):
    """x: any-rank float array (e.g. NCHW).  Returns x / mean(x)."""
    orig_shape = x.shape
    n = x.size
    flat = x.reshape(-1)                              # free for contiguous arrays

    # ---------- fast single-pass path: whole slab resident in VMEM ----------
    if n % 512 == 0:
        fast_shape = (n // 512, 512)
    elif n % 128 == 0:
        fast_shape = (n // 128, 128)
    else:
        fast_shape = (1, n)
    padded_f32_bytes = (_round_up(fast_shape[0], 8)
                        * _round_up(fast_shape[1], 128) * 4)
    if padded_f32_bytes <= FAST_PATH_MAX_BYTES:
        out2 = pl.pallas_call(
            functools.partial(_fused_kernel, numel=n),
            out_shape=jax.ShapeDtypeStruct(fast_shape, x.dtype),
            compiler_params=pltpu.CompilerParams(
                vmem_limit_bytes=32 * 1024 * 1024),
        )(flat.reshape(fast_shape))
        return out2.reshape(orig_shape)

    # ---------- streaming two-pass path ----------
    lw, pad = _pick_lane_width(n)
    if pad:
        # TODO(synk): rare branch (numel not a multiple of 128) still pays one
        # extra HBM round-trip for the <=127-element pad + final slice.
        flat = jnp.pad(flat, (0, pad))
    rows = (n + pad) // lw
    x2 = flat.reshape(rows, lw)

    block_r = BLOCK_ELEMS // lw                        # 2 MiB f32 tiles
    num_tiles = pl.cdiv(rows, block_r)
    # Shard pass 1 across the leading "parallel" axis (both TCs on v7x);
    # on 1-TC chips the extra shard is sequential and costs <= 1 dup tile.
    num_shards = 2 if num_tiles >= 8 else 1
    tiles_per_shard = pl.cdiv(num_tiles, num_shards)
    needs_mask = (rows % block_r != 0) or (num_shards * tiles_per_shard != num_tiles)
    last_tile = num_tiles - 1

    # ---- Pass 1: tiled global sum (double-buffered input, resident accumulator).
    psums = pl.pallas_call(
        functools.partial(_sum_kernel, rows=rows, block_r=block_r,
                          tiles_per_shard=tiles_per_shard, needs_mask=needs_mask),
        out_shape=jax.ShapeDtypeStruct((num_shards * 8, lw), jnp.float32),
        grid=(num_shards, tiles_per_shard),
        in_specs=[pl.BlockSpec(
            (block_r, lw),
            lambda c, j: (jnp.minimum(c * tiles_per_shard + j, last_tile), 0))],
        out_specs=pl.BlockSpec((8, lw), lambda c, j: (c, 0)),
        scratch_shapes=[pltpu.VMEM((1, lw), jnp.float32)],
        compiler_params=pltpu.CompilerParams(
            dimension_semantics=("parallel", "arbitrary")),
    )(x2)

    # Exact inverse mean; count = original numel (torch sum(ones)/numel semantics).
    inv_mean = (jnp.float32(n) / jnp.sum(psums)).reshape(1)

    # ---- Pass 2: tiled elementwise scale, inv_mean fed via SMEM scalar.
    out2 = pl.pallas_call(
        _scale_kernel,
        out_shape=jax.ShapeDtypeStruct(x2.shape, x.dtype),
        grid=(num_tiles,),
        in_specs=[
            pl.BlockSpec(memory_space=pltpu.MemorySpace.SMEM),     # inv_mean
            pl.BlockSpec((block_r, lw), lambda i: (i, 0)),         # x tile
        ],
        out_specs=pl.BlockSpec((block_r, lw), lambda i: (i, 0)),
        compiler_params=pltpu.CompilerParams(
            dimension_semantics=("parallel",)),                    # megacore on v7x
    )(inv_mean, x2)

    out_flat = out2.reshape(-1)
    if pad:
        out_flat = out_flat[:n]
    return out_flat.reshape(orig_shape)


if __name__ == "__main__":
    key = jax.random.PRNGKey(0)
    k1, k2, k3, k4 = jax.random.split(key, 4)

    # Primary small example consistent with a CNN front-end (NCHW).
    x_small = jax.random.normal(k1, (2, 4, 16, 16), dtype=jnp.float32) + 1.0
    # Extra self-checks covering the other dispatch paths.
    x_odd = jax.random.normal(k2, (2, 4, 15, 15), dtype=jnp.float32) + 1.0    # fast path, (1, n) view
    x_mid = jax.random.normal(k3, (2, 8, 256, 320), dtype=jnp.float32) + 1.0  # streaming, 1 shard, ragged tile
    x_big = jax.random.normal(k4, (8, 1025, 512), dtype=jnp.float32) + 1.0    # streaming, 2 shards, ragged + dup tile

    for x in (x_small, x_odd, x_mid, x_big):
        out = jax.block_until_ready(contrast_normalize(x))
        ref = x / (jnp.sum(x) / x.size)
        assert out.shape == x.shape and out.dtype == x.dtype
        assert jnp.allclose(out, ref, rtol=1e-4, atol=1e-5), x.shape

    print("KERNEL_OK")
</pallas_src>

<mosaic_0001>
module attributes {stable_mosaic.version = 11 : i64} {
  func.func @_fused_kernel(%arg0: memref<4x512xf32, #tpu.memory_space<vmem>>, %arg1: memref<4x512xf32, #tpu.memory_space<vmem>>) attributes {dimension_semantics = [], scalar_prefetch = 0 : i64, scratch_operands = 0 : i64, tpu.core_type = #tpu.core_type<tc>} {
    %c0 = arith.constant 0 : index
    %c0_0 = arith.constant 0 : index
    %0 = vector.load %arg0[%c0, %c0_0] : memref<4x512xf32, #tpu.memory_space<vmem>>, vector<4x512xf32>
    %1 = vector.shape_cast %0 : vector<4x512xf32> to vector<1x4x512xf32>
    %cst = arith.constant dense<0.000000e+00> : vector<1xf32>
    %2 = vector.multi_reduction <add>, %1, %cst [1, 2] : vector<1x4x512xf32> to vector<1xf32>
    %3 = vector.shape_cast %2 : vector<1xf32> to vector<1x1x1xf32>
    %4 = vector.extract %3[0, 0, 0] : f32 from vector<1x1x1xf32>
    %5 = vector.broadcast %4 : f32 to vector<1x1xf32>
    %cst_1 = arith.constant 2.048000e+03 : f32
    %6 = vector.broadcast %cst_1 : f32 to vector<1x1xf32>
    %7 = arith.divf %6, %5 : vector<1x1xf32>
    %8 = vector.broadcast %7 : vector<1x1xf32> to vector<4x512xf32>
    %9 = arith.mulf %0, %8 : vector<4x512xf32>
    %c0_2 = arith.constant 0 : index
    %c0_3 = arith.constant 0 : index
    %10 = vector.load %arg1[%c0_2, %c0_3] : memref<4x512xf32, #tpu.memory_space<vmem>>, vector<4x512xf32>
    tpu.vector_store %arg1[%c0_2, %c0_3], %9 {strides = array<i32>} : memref<4x512xf32, #tpu.memory_space<vmem>>, vector<4x512xf32>,
    return
  }
}

</mosaic_0001>

<bundles_post_ra>
// kernel: contrast_normalize.1
= control target key start
LH: loop header
LB: loop body
LE: loop exit
PB: predicated region body
PF: predicated region fallthrough
CT: control target
= control target key end

     0   :  { %vm16_vm0 = vcmask 1043456   ;;  %s72_s0 = inlined_call_operand.vmem [shape: f32[4,512], index: 0, kind: input, shape index: {}]   ;;  %s73_s1 = inlined_call_operand.vmem [shape: f32[4,512], index: 1, kind: output, shape index: {}]  }
   0x1   :  { %v8_v0 = vld [vmem:[%s72_s0] sm:$0xff]  ;;  %v9_v1 = vld [vmem:[%s72_s0 + $0x8] sm:$0xff] }
   0x2   :  { %v12_v2 = vcombine.high %v8_v0, %v8_v0  ;;  %v13_v3 = vcombine.high %v9_v1, %v9_v1  ;;  %v17_v4 = vsel %vm16_vm0, %v8_v0, 0.0  ;;  %v20_v6 = vsel %vm16_vm0, %v9_v1, 0.0 }
   0x4   :  { %v18_v5 = vsel %vm16_vm0, %v12_v2, 0.0  ;;  %v22_v8 = vsel %vm16_vm0, %v13_v3, 0.0 }
   0x5   :  { %v19_v7 = vadd.f32 %v18_v5, %v17_v4 }
   0x7   :  { %v21_v9 = vadd.f32 %v20_v6, %v19_v7 }
   0x9   :  { %v23_v10 = vadd.f32 %v22_v8, %v21_v9 }
   0xb   :  { %24 = vadd.xlane.f32.xlu0 %v23_v10 }
  0x94   :  { %v25_v11 = vpop.xlane.xlu0 %24 }
  0x95   :  { %v26_v12 = vrot.slane %v25_v11, 4 }
  0x97   :  { %v27_v13 = vadd.f32 %v26_v12, %v25_v11 }
  0x99   :  { %v28_v14 = vrot.slane %v27_v13, 2 }
  0x9b   :  { %v29_v15 = vadd.f32 %v28_v14, %v27_v13 }
  0x9d   :  { %v30_v16 = vrot.slane %v29_v15, 1 }
  0x9f   :  { %v31_v17 = vadd.f32 %v30_v16, %v29_v15 }
  0xa1   :  { %44 = vpush %v31_v17 }
  0xd2   :  { %s45_s10 = spop %44 }
  0xd3   :  { %v33_v18 = vstv %s45_s10 }
  0xd4   :  { %48 = vrcp.f32 %v33_v18 }
  0xe1   :  { %v49_v19 = vpop.eup %48 }
  0xe2   :  { %v35_v20 = vmul.f32 2048.0, %v49_v19 }
  0xe4   :  { %v36_v21 = vmul.f32 %v35_v20, %v8_v0  ;;  %v37_v22 = vmul.f32 %v35_v20, %v9_v1 }
  0xe6   :  { %38 = vst [vmem:[%s73_s1] sm:$0xff] %v36_v21  ;;  %39 = vst [vmem:[%s73_s1 + $0x8] sm:$0xff] %v37_v22 }

</bundles_post_ra>
